<compile_context>
chip_gen: v5e
topology: v5e:2x2
jax: 0.10.0
libtpu: 0.0.40
codegen_flags: <defaults>
</compile_context>

<pallas_src>
import functools

import jax
import jax.numpy as jnp
import numpy as np
from jax.experimental import pallas as pl
from jax.experimental.pallas import tpu as pltpu

_LANE = 128            # TPU vreg lane width
_ROW_CHUNK = 256       # sublane rows per in-kernel chunk (bounds live vregs to ~32)
_TARGET_TM = 2048      # lane-tile target for the streamed axis
_TM_SINGLE_MAX = 4096  # if M fits below this, take the whole axis in one block (no tail)
_MAX_UNROLL = 64       # max statically-unrolled chunk bodies before switching to pl.loop
_ROW_RC = 128          # row chunk for the transposed (dim == last axis) path
_LANE_RC = 256         # lane chunk over features for the transposed path


# --------------------------- hardware-derived budgets --------------------------- #

@functools.lru_cache(maxsize=None)
def _vmem_limits():
    """(block budget, scoped vmem limit) derived from the local chip's VMEM capacity.

    v5e/v6e have 128 MiB VMEM per TensorCore, v7x only 64 MiB; deriving the budget keeps
    tile choices near-optimal on all three without OOM-ing the smaller part.
    """
    cap = 64 * 1024 * 1024
    try:
        info = pltpu.get_tpu_info()
        c = getattr(info, "vmem_capacity_bytes", None)
        if c:
            cap = int(c)
    except Exception:
        pass
    limit = max(32 * 1024 * 1024, min(cap * 3 // 4, 100 * 1024 * 1024))
    budget = limit // 2
    return budget, limit


def _pick_tm(M, per_col_bytes, budget):
    """Lane tile over the streamed axis: biggest block that double-buffers in VMEM."""
    cap = max(_LANE, budget // (2 * per_col_bytes))
    if M <= cap and M <= _TM_SINGLE_MAX:
        return M                                  # whole axis in one block (no tail masking)
    tm = min(_TARGET_TM, cap, M)
    return max(_LANE, (tm // _LANE) * _LANE)


def _pick_tb(B, block_row_bytes, budget):
    """Batch rows per block: amortizes grid-step overhead when C*tm is small.

    Must divide B exactly (no out-of-bounds batch rows can leak into the statistics).
    """
    if B <= 1:
        return 1
    cap = max(1, budget // (2 * block_row_bytes))                # double-buffered
    target = max(1, -(-(3 * (1 << 19)) // block_row_bytes))      # ~1.5 MiB block target
    tb_max = int(min(B, cap, target, 4096))
    if B >= 4:                                 # keep >= 2 parallel blocks for megacore
        tb_max = min(tb_max, B // 2)
    tb_max = max(tb_max, 1)
    for tb in range(tb_max, 0, -1):
        if B % tb == 0:
            return tb
    return 1


def _chunks(total, step):
    return tuple((s, min(step, total - s)) for s in range(0, total, step))


# ----------------------------- Pallas kernels (B,C,M) --------------------------- #

def _stats_kernel_bcm(*refs, tb, tm, M, C, has_mask, n_split, nj_inner, needs_tail):
    """Partial per-feature sum / sum-of-squares (and kept-column count) over M.

    Accumulates directly into the resident output blocks (their index_map is constant
    along the reduction axis); per-chunk ref loads keep the live vreg set small.
    """
    if has_mask:
        x_ref, m_ref, sum_ref, sq_ref, cnt_ref = refs
    else:
        x_ref, sum_ref, sq_ref = refs
        m_ref = cnt_ref = None

    jj = pl.program_id(1)

    @pl.when(jj == 0)
    def _init():
        sum_ref[...] = jnp.zeros(sum_ref.shape, sum_ref.dtype)
        sq_ref[...] = jnp.zeros(sq_ref.shape, sq_ref.dtype)
        if has_mask:
            cnt_ref[...] = jnp.zeros(cnt_ref.shape, cnt_ref.dtype)

    # global column offset of this block (the leading grid axis may carry a j-split so
    # both v7x TensorCores have work even when B == 1)
    if n_split > 1:
        j_global = (pl.program_id(0) % n_split) * nj_inner + jj
    else:
        j_global = jj
    col_base = j_global * tm

    lane_chunks = _chunks(tm, _LANE)
    row_chunks = _chunks(C, _ROW_CHUNK)

    def process_t(t):
        for (l, lw) in lane_chunks:
            col_ok = None
            if needs_tail:
                col = col_base + l + jax.lax.broadcasted_iota(jnp.int32, (1, lw), 1)
                col_ok = col < M
            keep = None
            if has_mask:
                # int8 mask streamed straight from HBM; negate/cast in-kernel (free VPU op)
                keep = 1.0 - m_ref[t, :, pl.ds(l, lw)].astype(jnp.float32)      # (1, lw)
                kc = keep if col_ok is None else jnp.where(col_ok, keep, 0.0)
                cnt_ref[0, :, pl.ds(0, lw)] += kc
            for (r, rw) in row_chunks:
                xc = x_ref[t, pl.ds(r, rw), pl.ds(l, lw)].astype(jnp.float32)   # (rw, lw)
                if keep is not None:
                    xc = xc * keep
                if col_ok is not None:
                    xc = jnp.where(col_ok, xc, 0.0)   # applied last: kills OOB garbage
                sum_ref[0, pl.ds(r, rw), pl.ds(0, lw)] += xc
                sq_ref[0, pl.ds(r, rw), pl.ds(0, lw)] += xc * xc

    n_bodies = tb * len(lane_chunks) * len(row_chunks)
    if tb == 1:
        process_t(0)
    elif n_bodies <= _MAX_UNROLL:
        for t in range(tb):
            process_t(t)
    else:
        @pl.loop(0, tb)
        def _(t):
            process_t(t)


def _norm_kernel_bcm(x_ref, st_ref, o_ref, *, tb, tm, C):
    """y = (x - running_mean) * inv_std, per-chunk so live vregs stay bounded."""
    lane_chunks = _chunks(tm, _LANE)
    row_chunks = _chunks(C, _ROW_CHUNK)

    def process_t(t):
        for (r, rw) in row_chunks:
            mean = st_ref[0, pl.ds(r, rw), :]     # (rw, 1)
            rstd = st_ref[1, pl.ds(r, rw), :]
            for (l, lw) in lane_chunks:
                xc = x_ref[t, pl.ds(r, rw), pl.ds(l, lw)].astype(jnp.float32)
                o_ref[t, pl.ds(r, rw), pl.ds(l, lw)] = ((xc - mean) * rstd).astype(o_ref.dtype)

    n_bodies = tb * len(lane_chunks) * len(row_chunks)
    if tb == 1:
        process_t(0)
    elif n_bodies <= _MAX_UNROLL:
        for t in range(tb):
            process_t(t)
    else:
        @pl.loop(0, tb)
        def _(t):
            process_t(t)


# ------------------------ Pallas kernels, dim == last axis ---------------------- #

def _stats_kernel_rc(*refs, tr, R, C, has_mask, needs_tail):
    """X viewed as (R, C), features on lanes.  Each grid step reduces its own row block
    into a (1, 1, C) partial; the cross-block combine is a tiny XLA op."""
    if has_mask:
        x_ref, m_ref, sum_ref, sq_ref = refs
    else:
        x_ref, sum_ref, sq_ref = refs
        m_ref = None

    sum_ref[...] = jnp.zeros(sum_ref.shape, sum_ref.dtype)
    sq_ref[...] = jnp.zeros(sq_ref.shape, sq_ref.dtype)

    row_base = pl.program_id(0) * tr
    lane_chunks = _chunks(C, _LANE_RC)

    def do_rows(rstart, rw):
        keep = None
        if has_mask:
            keep = 1.0 - m_ref[pl.ds(rstart, rw), :].astype(jnp.float32)        # (rw, 1)
        row_ok = None
        if needs_tail:
            rid = row_base + rstart + jax.lax.broadcasted_iota(jnp.int32, (rw, 1), 0)
            row_ok = rid < R
        for (l, lw) in lane_chunks:
            xc = x_ref[pl.ds(rstart, rw), pl.ds(l, lw)].astype(jnp.float32)     # (rw, lw)
            if keep is not None:
                xc = xc * keep
            if row_ok is not None:
                xc = jnp.where(row_ok, xc, 0.0)   # applied last: kills OOB garbage
            sum_ref[0, :, pl.ds(l, lw)] += jnp.sum(xc, axis=0, keepdims=True)
            sq_ref[0, :, pl.ds(l, lw)] += jnp.sum(xc * xc, axis=0, keepdims=True)

    if tr <= _ROW_RC:
        do_rows(0, tr)
    else:
        n_rc = tr // _ROW_RC
        if n_rc * len(lane_chunks) <= _MAX_UNROLL:
            for k in range(n_rc):
                do_rows(k * _ROW_RC, _ROW_RC)
        else:
            @pl.loop(0, n_rc)
            def _(k):
                do_rows(pl.multiple_of(k * _ROW_RC, _ROW_RC), _ROW_RC)


def _norm_kernel_rc(x_ref, st_ref, o_ref, *, tr, C):
    lane_chunks = _chunks(C, _LANE_RC)

    def do_rows(rstart, rw):
        for (l, lw) in lane_chunks:
            mean = st_ref[0:1, pl.ds(l, lw)]      # (1, lw) lane-aligned broadcast
            rstd = st_ref[1:2, pl.ds(l, lw)]
            xc = x_ref[pl.ds(rstart, rw), pl.ds(l, lw)].astype(jnp.float32)
            o_ref[pl.ds(rstart, rw), pl.ds(l, lw)] = ((xc - mean) * rstd).astype(o_ref.dtype)

    if tr <= _ROW_RC:
        do_rows(0, tr)
    else:
        n_rc = tr // _ROW_RC
        if n_rc * len(lane_chunks) <= _MAX_UNROLL:
            for k in range(n_rc):
                do_rows(k * _ROW_RC, _ROW_RC)
        else:
            @pl.loop(0, n_rc)
            def _(k):
                do_rows(pl.multiple_of(k * _ROW_RC, _ROW_RC), _ROW_RC)


# ------------------------------- kernel wrappers -------------------------------- #

def _feature_stats_bcm(x, mask_i8, budget, vlimit):
    B, C, M = x.shape
    has_mask = mask_i8 is not None
    reserve = 2 * (2 * C + 1) * _LANE * 4                  # double-buffered output blocks
    budget_eff = max(budget - reserve, budget // 4)
    per_col = C * x.dtype.itemsize + (1 if has_mask else 0)
    tm = _pick_tm(M, per_col, budget_eff)
    acc_w = min(tm, _LANE)
    tb = _pick_tb(B, per_col * tm, budget_eff)
    num_b = B // tb
    num_j = pl.cdiv(M, tm)
    needs_tail = (M % tm) != 0
    # If the only parallel axis would have extent 1, split the reduction range in two so
    # both TensorCores (v7x megacore) get work.
    n_split = 2 if (num_b == 1 and num_j >= 8 and num_j % 2 == 0) else 1
    nj_inner = num_j // n_split
    n_par = num_b * n_split

    if n_split == 1:
        def in_map(b, j):
            return (b, 0, j)
    else:
        def in_map(p, jj):
            return (p // n_split, 0, (p % n_split) * nj_inner + jj)

    def out_map(p, jj):
        return (p, 0, 0)

    kernel = functools.partial(
        _stats_kernel_bcm, tb=tb, tm=tm, M=M, C=C, has_mask=has_mask,
        n_split=n_split, nj_inner=nj_inner, needs_tail=needs_tail)

    in_specs = [pl.BlockSpec((tb, C, tm), in_map)]
    operands = [x]
    out_shapes = [jax.ShapeDtypeStruct((n_par, C, acc_w), jnp.float32),
                  jax.ShapeDtypeStruct((n_par, C, acc_w), jnp.float32)]
    out_specs = [pl.BlockSpec((1, C, acc_w), out_map),
                 pl.BlockSpec((1, C, acc_w), out_map)]
    if has_mask:
        in_specs.append(pl.BlockSpec((tb, 1, tm), in_map))
        operands.append(mask_i8)
        out_shapes.append(jax.ShapeDtypeStruct((n_par, 1, acc_w), jnp.float32))
        out_specs.append(pl.BlockSpec((1, 1, acc_w), out_map))

    res = pl.pallas_call(
        kernel,
        out_shape=tuple(out_shapes),
        grid_spec=pltpu.PrefetchScalarGridSpec(
            num_scalar_prefetch=0,
            grid=(n_par, nj_inner),                        # reduction axis last
            in_specs=in_specs,
            out_specs=out_specs),
        compiler_params=pltpu.CompilerParams(
            dimension_semantics=("parallel", "arbitrary"),
            vmem_limit_bytes=vlimit),
    )(*operands)
    if has_mask:
        return res[0], res[1], res[2]
    return res[0], res[1], None


def _normalize_bcm(x, stats_2c1, out_dtype, budget, vlimit):
    B, C, M = x.shape
    per_col = C * (x.dtype.itemsize + jnp.dtype(out_dtype).itemsize)
    tm = _pick_tm(M, per_col, budget)
    tb = _pick_tb(B, per_col * tm, budget)
    num_b = B // tb
    num_j = pl.cdiv(M, tm)
    kernel = functools.partial(_norm_kernel_bcm, tb=tb, tm=tm, C=C)
    return pl.pallas_call(
        kernel,
        out_shape=jax.ShapeDtypeStruct((B, C, M), out_dtype),
        grid_spec=pltpu.PrefetchScalarGridSpec(
            num_scalar_prefetch=0,
            grid=(num_b, num_j),
            in_specs=[pl.BlockSpec((tb, C, tm), lambda b, j: (b, 0, j)),
                      pl.BlockSpec((2, C, 1), lambda b, j: (0, 0, 0))],
            out_specs=pl.BlockSpec((tb, C, tm), lambda b, j: (b, 0, j))),
        compiler_params=pltpu.CompilerParams(
            dimension_semantics=("parallel", "parallel"),
            vmem_limit_bytes=vlimit),
    )(x, stats_2c1)


def _rc_rows(R, per_row_bytes, budget):
    if R <= _ROW_RC:
        return R
    cap = max(_ROW_RC, budget // (2 * per_row_bytes))
    tr = min(R, cap, 16384)
    return max(_ROW_RC, (tr // _ROW_RC) * _ROW_RC)


def _feature_stats_rc(x_rc, mask_r1, budget, vlimit):
    R, C = x_rc.shape
    has_mask = mask_r1 is not None
    per_row = C * x_rc.dtype.itemsize + (1 if has_mask else 0)
    tr = _rc_rows(R, per_row, budget)
    num_i = pl.cdiv(R, tr)
    needs_tail = (R % tr) != 0
    kernel = functools.partial(_stats_kernel_rc, tr=tr, R=R, C=C,
                               has_mask=has_mask, needs_tail=needs_tail)
    in_specs = [pl.BlockSpec((tr, C), lambda i: (i, 0))]
    operands = [x_rc]
    if has_mask:
        in_specs.append(pl.BlockSpec((tr, 1), lambda i: (i, 0)))
        operands.append(mask_r1)
    return pl.pallas_call(
        kernel,
        out_shape=(jax.ShapeDtypeStruct((num_i, 1, C), jnp.float32),
                   jax.ShapeDtypeStruct((num_i, 1, C), jnp.float32)),
        grid_spec=pltpu.PrefetchScalarGridSpec(
            num_scalar_prefetch=0,
            grid=(num_i,),
            in_specs=in_specs,
            out_specs=[pl.BlockSpec((1, 1, C), lambda i: (i, 0, 0)),
                       pl.BlockSpec((1, 1, C), lambda i: (i, 0, 0))]),
        compiler_params=pltpu.CompilerParams(
            dimension_semantics=("parallel",),
            vmem_limit_bytes=vlimit),
    )(*operands)


def _normalize_rc(x_rc, stats_2c, out_dtype, budget, vlimit):
    R, C = x_rc.shape
    per_row = C * (x_rc.dtype.itemsize + jnp.dtype(out_dtype).itemsize)
    tr = _rc_rows(R, per_row, budget)
    num_i = pl.cdiv(R, tr)
    kernel = functools.partial(_norm_kernel_rc, tr=tr, C=C)
    return pl.pallas_call(
        kernel,
        out_shape=jax.ShapeDtypeStruct((R, C), out_dtype),
        grid_spec=pltpu.PrefetchScalarGridSpec(
            num_scalar_prefetch=0,
            grid=(num_i,),
            in_specs=[pl.BlockSpec((tr, C), lambda i: (i, 0)),
                      pl.BlockSpec((2, C), lambda i: (0, 0))],
            out_specs=pl.BlockSpec((tr, C), lambda i: (i, 0))),
        compiler_params=pltpu.CompilerParams(
            dimension_semantics=("parallel",),
            vmem_limit_bytes=vlimit),
    )(x_rc, stats_2c)


# ---------------------------------- Normalizer ---------------------------------- #

class Normalizer:
    """JAX/Pallas port of pygmalion Normalizer (running-stats normalization).

    NOTE: running stats are mutated as Python attributes holding device arrays,
    mirroring the eager torch module; this is not functional / jit / pmap safe.
    """

    def __init__(self, dim, num_features, eps=1e-5, dtype=jnp.float32):
        self.dim = dim
        self.num_features = num_features
        self.eps = eps
        self.n_observations = 0
        self.running_mean = jnp.zeros((num_features,), dtype=dtype)
        self.running_var = jnp.ones((num_features,), dtype=dtype)
        self.training = True

    def __call__(self, X, mask=None, track_running_stats=True):
        C = self.num_features
        ndim = X.ndim
        dim = self.dim % ndim
        if X.shape[dim] != C:
            raise ValueError(
                f"Expected {C} size for dimension {self.dim} but got tensor "
                f"of shape {tuple(X.shape)}")

        B = int(np.prod(X.shape[:dim], dtype=np.int64)) if dim > 0 else 1
        M = int(np.prod(X.shape[dim + 1:], dtype=np.int64)) if dim < ndim - 1 else 1
        total_cols = B * M
        budget, vlimit = _vmem_limits()

        use_rc = (M == 1)    # normalized dim is trailing -> lane-dense transposed mapping
        x_view = X.reshape(B, C) if use_rc else X.reshape(B, C, M)

        if self.training and track_running_stats:
            if mask is None:
                n = total_cols                                  # static Python int
                if use_rc:
                    s_p, q_p = _feature_stats_rc(x_view, None, budget, vlimit)
                    s = jnp.sum(s_p, axis=(0, 1))
                    q = jnp.sum(q_p, axis=(0, 1))
                else:
                    s_p, q_p, _ = _feature_stats_bcm(x_view, None, budget, vlimit)
                    s = jnp.sum(s_p, axis=(0, 2))
                    q = jnp.sum(q_p, axis=(0, 2))
            else:
                mask_b = jnp.asarray(mask, dtype=bool)
                if use_rc:
                    m_view = mask_b.reshape(B, 1).astype(jnp.int8)
                    s_p, q_p = _feature_stats_rc(x_view, m_view, budget, vlimit)
                    s = jnp.sum(s_p, axis=(0, 1))
                    q = jnp.sum(q_p, axis=(0, 1))
                    # TODO(synk): mask count not fused into the trailing-dim stats kernel;
                    # this is one extra (tiny) XLA pass over the int8 mask.
                    n = total_cols - jnp.sum(m_view, dtype=jnp.int32)
                else:
                    m_view = mask_b.reshape(B, 1, M).astype(jnp.int8)
                    s_p, q_p, c_p = _feature_stats_bcm(x_view, m_view, budget, vlimit)
                    s = jnp.sum(s_p, axis=(0, 2))
                    q = jnp.sum(q_p, axis=(0, 2))
                    # kept-column count fused into the stats kernel (exact as f32: each
                    # partial element counts far fewer than 2^24 columns)
                    n = jnp.round(jnp.sum(c_p)).astype(jnp.int32)

            n_f = jnp.asarray(n).astype(jnp.float32)
            denom = jnp.maximum(n_f, 1.0)
            mean = s / denom
            # Matches torch: masked columns count as zeros in the squared-deviation sum
            # (hence the total_cols*mean^2 term).  Clamp: the E[X^2]-style expansion can
            # go slightly negative under cancellation, which would NaN the rsqrt.
            var = (q - 2.0 * mean * s + float(total_cols) * mean * mean) / denom
            var = jnp.maximum(var, 0.0)

            n0 = self.n_observations
            n0_f = jnp.asarray(n0).astype(jnp.float32)
            tot_f = jnp.maximum(n0_f + n_f, 1.0)
            r = n0_f / tot_f
            w = n_f / tot_f
            rm = self.running_mean.astype(jnp.float32)
            rv = self.running_var.astype(jnp.float32)
            new_var = r * rv + w * var + (n0_f * n_f) / (tot_f * tot_f) * (mean - rm) ** 2
            new_mean = r * rm + w * mean
            upd = n_f > 0.0                    # fully-masked batch keeps old stats
            self.running_var = jnp.where(upd, new_var, rv).astype(self.running_var.dtype)
            self.running_mean = jnp.where(upd, new_mean, rm).astype(self.running_mean.dtype)
            self.n_observations = n0 + n

        # precompute mean / inv_std once (tiny (C,) XLA op); kernels are fused FMAs
        mean32 = self.running_mean.astype(jnp.float32)
        rstd32 = jax.lax.rsqrt(self.running_var.astype(jnp.float32) + self.eps)
        if use_rc:
            stats = jnp.stack([mean32, rstd32], axis=0)                    # (2, C)
            y = _normalize_rc(x_view, stats, X.dtype, budget, vlimit)
        else:
            stats = jnp.stack([mean32, rstd32], axis=0).reshape(2, C, 1)   # (2, C, 1)
            y = _normalize_bcm(x_view, stats, X.dtype, budget, vlimit)
        return y.reshape(X.shape)

    def unscale(self, Y):
        ndim = Y.ndim
        dim = self.dim % ndim
        shape = [self.num_features if i == dim else 1 for i in range(ndim)]
        return (Y * jnp.sqrt(self.running_var.reshape(shape) + self.eps)
                + self.running_mean.reshape(shape))


# ----------------------------------- reference ----------------------------------- #

def _reference_forward(X, dim, num_features, eps, mask=None):
    """Pure-JAX replica of the torch forward for a FRESH module in training mode."""
    C = num_features
    d = dim % X.ndim
    Xr = jnp.moveaxis(X, d, 0).reshape(C, -1)
    T = Xr.shape[-1]
    if mask is not None:
        Xr = Xr * (~mask).reshape(-1)[None, :].astype(Xr.dtype)
        n = T - int(jnp.sum(mask))
    else:
        n = T
    denom = float(max(1, n))
    mean = Xr.sum(axis=-1) / denom
    var = jnp.sum((Xr - mean[:, None]) ** 2, axis=-1) / denom
    # n_observations starts at 0 -> running stats become the batch stats
    shape = [C if i == d else 1 for i in range(X.ndim)]
    return (X - mean.reshape(shape)) / jnp.sqrt(var.reshape(shape) + eps)


if __name__ == "__main__":
    key = jax.random.PRNGKey(0)
    ks = jax.random.split(key, 8)

    # 1) NCHW, dim=1, no mask (mask-free stats kernel, TB>1 batch blocking)
    N, C, H, W = 2, 4, 16, 16
    x = jax.random.normal(ks[0], (N, C, H, W), dtype=jnp.float32) * 3.0 + 1.5
    norm = Normalizer(dim=1, num_features=C, eps=1e-5)
    y = jax.block_until_ready(norm(x))
    y_ref = _reference_forward(x, dim=1, num_features=C, eps=1e-5)
    np.testing.assert_allclose(np.asarray(y), np.asarray(y_ref), rtol=1e-5, atol=1e-5)
    assert y.shape == x.shape and y.dtype == x.dtype
    assert int(norm.n_observations) == N * H * W

    # 2) masked path (int8 mask streamed; kept-column count fused into stats kernel)
    mask = jax.random.bernoulli(ks[1], 0.3, (N, H, W))
    norm2 = Normalizer(dim=1, num_features=C, eps=1e-5)
    y2 = jax.block_until_ready(norm2(x, mask=mask))
    y2_ref = _reference_forward(x, dim=1, num_features=C, eps=1e-5, mask=mask)
    np.testing.assert_allclose(np.asarray(y2), np.asarray(y2_ref), rtol=1e-4, atol=1e-5)

    # 3) ragged flattened axis (uneven lane chunks within one block)
    x3 = jax.random.normal(ks[2], (2, 4, 16, 20), dtype=jnp.float32)
    norm3 = Normalizer(dim=1, num_features=4, eps=1e-5)
    y3 = jax.block_until_ready(norm3(x3))
    y3_ref = _reference_forward(x3, dim=1, num_features=4, eps=1e-5)
    np.testing.assert_allclose(np.asarray(y3), np.asarray(y3_ref), rtol=1e-5, atol=1e-5)

    # 4) dim == last axis (M == 1): transposed lane-dense path, with and without mask
    x4 = jax.random.normal(ks[3], (6, 10, 32), dtype=jnp.float32) * 2.0 - 0.7
    norm4 = Normalizer(dim=-1, num_features=32, eps=1e-5)
    y4 = jax.block_until_ready(norm4(x4))
    y4_ref = _reference_forward(x4, dim=-1, num_features=32, eps=1e-5)
    np.testing.assert_allclose(np.asarray(y4), np.asarray(y4_ref), rtol=1e-4, atol=1e-4)

    mask4 = jax.random.bernoulli(ks[4], 0.25, (6, 10))
    norm4b = Normalizer(dim=-1, num_features=32, eps=1e-5)
    y4b = jax.block_until_ready(norm4b(x4, mask=mask4))
    y4b_ref = _reference_forward(x4, dim=-1, num_features=32, eps=1e-5, mask=mask4)
    np.testing.assert_allclose(np.asarray(y4b), np.asarray(y4b_ref), rtol=1e-4, atol=1e-4)

    # 5) masked + in-kernel tail masking (M not a multiple of the lane tile)
    x5 = jax.random.normal(ks[5], (1, 3, 5000), dtype=jnp.float32) * 2.0 + 0.5
    mask5 = jax.random.bernoulli(ks[6], 0.4, (1, 5000))
    norm5 = Normalizer(dim=1, num_features=3, eps=1e-5)
    y5 = jax.block_until_ready(norm5(x5, mask=mask5))
    y5_ref = _reference_forward(x5, dim=1, num_features=3, eps=1e-5, mask=mask5)
    np.testing.assert_allclose(np.asarray(y5), np.asarray(y5_ref), rtol=1e-4, atol=1e-4)

    # 6) B == 1 with many lane tiles: reduction range split across the parallel axis (v7x)
    x6 = jax.random.normal(ks[7], (1, 8, 16384), dtype=jnp.float32) * 1.5 - 1.0
    norm6 = Normalizer(dim=1, num_features=8, eps=1e-5)
    y6 = jax.block_until_ready(norm6(x6))
    y6_ref = _reference_forward(x6, dim=1, num_features=8, eps=1e-5)
    np.testing.assert_allclose(np.asarray(y6), np.asarray(y6_ref), rtol=1e-4, atol=1e-4)

    # 7) large batch axis: TB blocking + in-kernel pl.loop over the batch rows
    x7 = (jax.random.normal(jax.random.PRNGKey(7), (128, 4, 16, 16), dtype=jnp.float32)
          * 3.0 + 1.5)
    mask7 = jax.random.bernoulli(jax.random.PRNGKey(8), 0.3, (128, 16, 16))
    norm7 = Normalizer(dim=1, num_features=4, eps=1e-5)
    y7 = jax.block_until_ready(norm7(x7, mask=mask7))
    y7_ref = _reference_forward(x7, dim=1, num_features=4, eps=1e-5, mask=mask7)
    np.testing.assert_allclose(np.asarray(y7), np.asarray(y7_ref), rtol=1e-4, atol=1e-4)

    print("KERNEL_OK")
</pallas_src>

<mosaic_0001>
module attributes {stable_mosaic.version = 11 : i64} {
  func.func @_stats_kernel_bcm(%arg0: i32, %arg1: i32, %arg2: memref<2x4x256xf32, #tpu.memory_space<vmem>>, %arg3: memref<1x4x128xf32, #tpu.memory_space<vmem>>, %arg4: memref<1x4x128xf32, #tpu.memory_space<vmem>>) attributes {dimension_semantics = [#tpu.dimension_semantics<parallel>, #tpu.dimension_semantics<arbitrary>], iteration_bounds = array<i64: 1, 1>, scalar_prefetch = 0 : i64, scratch_operands = 0 : i64, tpu.core_type = #tpu.core_type<tc>, window_params = [{transform_indices = @transform_0, window_bounds = array<i64: 2, 4, 256>}, {transform_indices = @transform_1, window_bounds = array<i64: 1, 4, 128>}, {transform_indices = @transform_2, window_bounds = array<i64: 1, 4, 128>}]} {
    %c0_i32 = arith.constant 0 : i32
    %0 = arith.cmpi eq, %arg1, %c0_i32 : i32
    %1 = arith.extui %0 : i1 to i32
    %c0_i32_0 = arith.constant 0 : i32
    %2 = arith.cmpi ne, %1, %c0_i32_0 : i32
    scf.if %2 {
      %cst = arith.constant 0.000000e+00 : f32
      %63 = vector.broadcast %cst : f32 to vector<1x4x128xf32>
      %c0_58 = arith.constant 0 : index
      %c0_59 = arith.constant 0 : index
      %c0_60 = arith.constant 0 : index
      %64 = vector.load %arg3[%c0_58, %c0_59, %c0_60] : memref<1x4x128xf32, #tpu.memory_space<vmem>>, vector<1x4x128xf32>
      tpu.vector_store %arg3[%c0_58, %c0_59, %c0_60], %63 {strides = array<i32>} : memref<1x4x128xf32, #tpu.memory_space<vmem>>, vector<1x4x128xf32>,
      %cst_61 = arith.constant 0.000000e+00 : f32
      %65 = vector.broadcast %cst_61 : f32 to vector<1x4x128xf32>
      %c0_62 = arith.constant 0 : index
      %c0_63 = arith.constant 0 : index
      %c0_64 = arith.constant 0 : index
      %66 = vector.load %arg4[%c0_62, %c0_63, %c0_64] : memref<1x4x128xf32, #tpu.memory_space<vmem>>, vector<1x4x128xf32>
      tpu.vector_store %arg4[%c0_62, %c0_63, %c0_64], %65 {strides = array<i32>} : memref<1x4x128xf32, #tpu.memory_space<vmem>>, vector<1x4x128xf32>,
    } else {
    }
    %c0 = arith.constant 0 : index
    %c0_1 = arith.constant 0 : index
    %c0_2 = arith.constant 0 : index
    %3 = vector.load %arg2[%c0, %c0_1, %c0_2] : memref<2x4x256xf32, #tpu.memory_space<vmem>>, vector<1x4x128xf32>
    %4 = vector.shape_cast %3 : vector<1x4x128xf32> to vector<4x128xf32>
    %c0_3 = arith.constant 0 : index
    %c0_4 = arith.constant 0 : index
    %c0_5 = arith.constant 0 : index
    %5 = vector.load %arg3[%c0_3, %c0_4, %c0_5] : memref<1x4x128xf32, #tpu.memory_space<vmem>>, vector<1x4x128xf32>
    %6 = vector.shape_cast %5 : vector<1x4x128xf32> to vector<4x128xf32>
    %7 = arith.addf %6, %4 : vector<4x128xf32>
    %c0_6 = arith.constant 0 : index
    %c0_7 = arith.constant 0 : index
    %c0_8 = arith.constant 0 : index
    %8 = vector.load %arg3[%c0_6, %c0_7, %c0_8] : memref<1x4x128xf32, #tpu.memory_space<vmem>>, vector<1x4x128xf32>
    %9 = vector.shape_cast %8 : vector<1x4x128xf32> to vector<4x128xf32>
    %10 = vector.shape_cast %7 : vector<4x128xf32> to vector<1x4x128xf32>
    tpu.vector_store %arg3[%c0_6, %c0_7, %c0_8], %10 {strides = array<i32>} : memref<1x4x128xf32, #tpu.memory_space<vmem>>, vector<1x4x128xf32>,
    %c0_9 = arith.constant 0 : index
    %c0_10 = arith.constant 0 : index
    %c0_11 = arith.constant 0 : index
    %11 = vector.load %arg4[%c0_9, %c0_10, %c0_11] : memref<1x4x128xf32, #tpu.memory_space<vmem>>, vector<1x4x128xf32>
    %12 = vector.shape_cast %11 : vector<1x4x128xf32> to vector<4x128xf32>
    %13 = arith.mulf %4, %4 : vector<4x128xf32>
    %14 = arith.addf %12, %13 : vector<4x128xf32>
    %c0_12 = arith.constant 0 : index
    %c0_13 = arith.constant 0 : index
    %c0_14 = arith.constant 0 : index
    %15 = vector.load %arg4[%c0_12, %c0_13, %c0_14] : memref<1x4x128xf32, #tpu.memory_space<vmem>>, vector<1x4x128xf32>
    %16 = vector.shape_cast %15 : vector<1x4x128xf32> to vector<4x128xf32>
    %17 = vector.shape_cast %14 : vector<4x128xf32> to vector<1x4x128xf32>
    tpu.vector_store %arg4[%c0_12, %c0_13, %c0_14], %17 {strides = array<i32>} : memref<1x4x128xf32, #tpu.memory_space<vmem>>, vector<1x4x128xf32>,
    %c0_15 = arith.constant 0 : index
    %c0_16 = arith.constant 0 : index
    %c128 = arith.constant 128 : index
    %18 = vector.load %arg2[%c0_15, %c0_16, %c128] : memref<2x4x256xf32, #tpu.memory_space<vmem>>, vector<1x4x128xf32>
    %19 = vector.shape_cast %18 : vector<1x4x128xf32> to vector<4x128xf32>
    %c0_17 = arith.constant 0 : index
    %c0_18 = arith.constant 0 : index
    %c0_19 = arith.constant 0 : index
    %20 = vector.load %arg3[%c0_17, %c0_18, %c0_19] : memref<1x4x128xf32, #tpu.memory_space<vmem>>, vector<1x4x128xf32>
    %21 = vector.shape_cast %20 : vector<1x4x128xf32> to vector<4x128xf32>
    %22 = arith.addf %21, %19 : vector<4x128xf32>
    %c0_20 = arith.constant 0 : index
    %c0_21 = arith.constant 0 : index
    %c0_22 = arith.constant 0 : index
    %23 = vector.load %arg3[%c0_20, %c0_21, %c0_22] : memref<1x4x128xf32, #tpu.memory_space<vmem>>, vector<1x4x128xf32>
    %24 = vector.shape_cast %23 : vector<1x4x128xf32> to vector<4x128xf32>
    %25 = vector.shape_cast %22 : vector<4x128xf32> to vector<1x4x128xf32>
    tpu.vector_store %arg3[%c0_20, %c0_21, %c0_22], %25 {strides = array<i32>} : memref<1x4x128xf32, #tpu.memory_space<vmem>>, vector<1x4x128xf32>,
    %c0_23 = arith.constant 0 : index
    %c0_24 = arith.constant 0 : index
    %c0_25 = arith.constant 0 : index
    %26 = vector.load %arg4[%c0_23, %c0_24, %c0_25] : memref<1x4x128xf32, #tpu.memory_space<vmem>>, vector<1x4x128xf32>
    %27 = vector.shape_cast %26 : vector<1x4x128xf32> to vector<4x128xf32>
    %28 = arith.mulf %19, %19 : vector<4x128xf32>
    %29 = arith.addf %27, %28 : vector<4x128xf32>
    %c0_26 = arith.constant 0 : index
    %c0_27 = arith.constant 0 : index
    %c0_28 = arith.constant 0 : index
    %30 = vector.load %arg4[%c0_26, %c0_27, %c0_28] : memref<1x4x128xf32, #tpu.memory_space<vmem>>, vector<1x4x128xf32>
    %31 = vector.shape_cast %30 : vector<1x4x128xf32> to vector<4x128xf32>
    %32 = vector.shape_cast %29 : vector<4x128xf32> to vector<1x4x128xf32>
    tpu.vector_store %arg4[%c0_26, %c0_27, %c0_28], %32 {strides = array<i32>} : memref<1x4x128xf32, #tpu.memory_space<vmem>>, vector<1x4x128xf32>,
    %c1 = arith.constant 1 : index
    %c0_29 = arith.constant 0 : index
    %c0_30 = arith.constant 0 : index
    %33 = vector.load %arg2[%c1, %c0_29, %c0_30] : memref<2x4x256xf32, #tpu.memory_space<vmem>>, vector<1x4x128xf32>
    %34 = vector.shape_cast %33 : vector<1x4x128xf32> to vector<4x128xf32>
    %c0_31 = arith.constant 0 : index
    %c0_32 = arith.constant 0 : index
    %c0_33 = arith.constant 0 : index
    %35 = vector.load %arg3[%c0_31, %c0_32, %c0_33] : memref<1x4x128xf32, #tpu.memory_space<vmem>>, vector<1x4x128xf32>
    %36 = vector.shape_cast %35 : vector<1x4x128xf32> to vector<4x128xf32>
    %37 = arith.addf %36, %34 : vector<4x128xf32>
    %c0_34 = arith.constant 0 : index
    %c0_35 = arith.constant 0 : index
    %c0_36 = arith.constant 0 : index
    %38 = vector.load %arg3[%c0_34, %c0_35, %c0_36] : memref<1x4x128xf32, #tpu.memory_space<vmem>>, vector<1x4x128xf32>
    %39 = vector.shape_cast %38 : vector<1x4x128xf32> to vector<4x128xf32>
    %40 = vector.shape_cast %37 : vector<4x128xf32> to vector<1x4x128xf32>
    tpu.vector_store %arg3[%c0_34, %c0_35, %c0_36], %40 {strides = array<i32>} : memref<1x4x128xf32, #tpu.memory_space<vmem>>, vector<1x4x128xf32>,
    %c0_37 = arith.constant 0 : index
    %c0_38 = arith.constant 0 : index
    %c0_39 = arith.constant 0 : index
    %41 = vector.load %arg4[%c0_37, %c0_38, %c0_39] : memref<1x4x128xf32, #tpu.memory_space<vmem>>, vector<1x4x128xf32>
    %42 = vector.shape_cast %41 : vector<1x4x128xf32> to vector<4x128xf32>
    %43 = arith.mulf %34, %34 : vector<4x128xf32>
    %44 = arith.addf %42, %43 : vector<4x128xf32>
    %c0_40 = arith.constant 0 : index
    %c0_41 = arith.constant 0 : index
    %c0_42 = arith.constant 0 : index
    %45 = vector.load %arg4[%c0_40, %c0_41, %c0_42] : memref<1x4x128xf32, #tpu.memory_space<vmem>>, vector<1x4x128xf32>
    %46 = vector.shape_cast %45 : vector<1x4x128xf32> to vector<4x128xf32>
    %47 = vector.shape_cast %44 : vector<4x128xf32> to vector<1x4x128xf32>
    tpu.vector_store %arg4[%c0_40, %c0_41, %c0_42], %47 {strides = array<i32>} : memref<1x4x128xf32, #tpu.memory_space<vmem>>, vector<1x4x128xf32>,
    %c1_43 = arith.constant 1 : index
    %c0_44 = arith.constant 0 : index
    %c128_45 = arith.constant 128 : index
    %48 = vector.load %arg2[%c1_43, %c0_44, %c128_45] : memref<2x4x256xf32, #tpu.memory_space<vmem>>, vector<1x4x128xf32>
    %49 = vector.shape_cast %48 : vector<1x4x128xf32> to vector<4x128xf32>
    %c0_46 = arith.constant 0 : index
    %c0_47 = arith.constant 0 : index
    %c0_48 = arith.constant 0 : index
    %50 = vector.load %arg3[%c0_46, %c0_47, %c0_48] : memref<1x4x128xf32, #tpu.memory_space<vmem>>, vector<1x4x128xf32>
    %51 = vector.shape_cast %50 : vector<1x4x128xf32> to vector<4x128xf32>
    %52 = arith.addf %51, %49 : vector<4x128xf32>
    %c0_49 = arith.constant 0 : index
    %c0_50 = arith.constant 0 : index
    %c0_51 = arith.constant 0 : index
    %53 = vector.load %arg3[%c0_49, %c0_50, %c0_51] : memref<1x4x128xf32, #tpu.memory_space<vmem>>, vector<1x4x128xf32>
    %54 = vector.shape_cast %53 : vector<1x4x128xf32> to vector<4x128xf32>
    %55 = vector.shape_cast %52 : vector<4x128xf32> to vector<1x4x128xf32>
    tpu.vector_store %arg3[%c0_49, %c0_50, %c0_51], %55 {strides = array<i32>} : memref<1x4x128xf32, #tpu.memory_space<vmem>>, vector<1x4x128xf32>,
    %c0_52 = arith.constant 0 : index
    %c0_53 = arith.constant 0 : index
    %c0_54 = arith.constant 0 : index
    %56 = vector.load %arg4[%c0_52, %c0_53, %c0_54] : memref<1x4x128xf32, #tpu.memory_space<vmem>>, vector<1x4x128xf32>
    %57 = vector.shape_cast %56 : vector<1x4x128xf32> to vector<4x128xf32>
    %58 = arith.mulf %49, %49 : vector<4x128xf32>
    %59 = arith.addf %57, %58 : vector<4x128xf32>
    %c0_55 = arith.constant 0 : index
    %c0_56 = arith.constant 0 : index
    %c0_57 = arith.constant 0 : index
    %60 = vector.load %arg4[%c0_55, %c0_56, %c0_57] : memref<1x4x128xf32, #tpu.memory_space<vmem>>, vector<1x4x128xf32>
    %61 = vector.shape_cast %60 : vector<1x4x128xf32> to vector<4x128xf32>
    %62 = vector.shape_cast %59 : vector<4x128xf32> to vector<1x4x128xf32>
    tpu.vector_store %arg4[%c0_55, %c0_56, %c0_57], %62 {strides = array<i32>} : memref<1x4x128xf32, #tpu.memory_space<vmem>>, vector<1x4x128xf32>,
    return
  }
  func.func @transform_0(%arg0: i32, %arg1: i32) -> (i32, i32, i32) {
    %c0_i32 = arith.constant 0 : i32
    %c0_i32_0 = arith.constant 0 : i32
    return %arg0, %c0_i32, %arg1 : i32, i32, i32
  }
  func.func @transform_1(%arg0: i32, %arg1: i32) -> (i32, i32, i32) {
    %c0_i32 = arith.constant 0 : i32
    %c0_i32_0 = arith.constant 0 : i32
    %c0_i32_1 = arith.constant 0 : i32
    return %arg0, %c0_i32, %c0_i32_0 : i32, i32, i32
  }
  func.func @transform_2(%arg0: i32, %arg1: i32) -> (i32, i32, i32) {
    %c0_i32 = arith.constant 0 : i32
    %c0_i32_0 = arith.constant 0 : i32
    %c0_i32_1 = arith.constant 0 : i32
    return %arg0, %c0_i32, %c0_i32_0 : i32, i32, i32
  }
}

</mosaic_0001>

<bundles_post_ra>
// kernel: tpu_custom_call.1
= control target key start
LH: loop header
LB: loop body
LE: loop exit
PB: predicated region body
PF: predicated region fallthrough
CT: control target
= control target key end

     0   :  { %8 = vsyncpa [#allocation3], 0  ;;  %s214_s0 = inlined_call_operand.hbm [shape: f32[2,4,256], index: 0, kind: input, shape index: {}]   ;;  %s215_s1 = inlined_call_operand.hbm [shape: f32[1,4,128], index: 1, kind: output, shape index: {0}]   ;;  %s216_s2 = inlined_call_operand.hbm [shape: f32[1,4,128], index: 2, kind: output, shape index: {1}]  }
   0x1   :  { %9 = vsyncpa [#allocation4], 0 }
   0x2   :  { %10 = vsyncpa [#allocation7], 0  ;;  %s15_s11 = sshll.u32 %s214_s0, 4  ;;  %s184_s12 = smov [#allocation2]   ;;  %s16_s11 = int_to_ptr.hbm [resolvable:$true] %s15_s11 }
   0x3   :  { %s17_s13 = sshll.u32 %s184_s12, 4  ;;  %s185_s14 = smov 128   ;;  %s18_s13 = int_to_ptr.vmem [resolvable:$true] %s17_s13 }
   0x4   :  { %s186_s15 = smov 8  }
   0x5   :  { %23 = dma.hbm_to_vmem [thread:$0]  %s16_s11, 256, %s18_s13, [#allocation3], %s185_s14, %s185_s14, %s186_s15  }
   0x6   :  { %178 = dma.done.wait [#allocation3], 256  }
   0x7   :  { %179 = vsyncadd [#allocation3], 4294967040  ;;  %v187_v0 = vmov 0.0   ;;  %v34_v1 = vld [vmem:[#allocation2] sm:$0xf]  ;;  %s188_s0 = smov [#allocation5]  }
   0x8   :  { %32 = vst [vmem:[#allocation5] sm:$0xf] %v187_v0  ;;  %v39_v3 = vmul.f32 %v34_v1, %v34_v1  ;;  %v42_v7 = vld [vmem:[#allocation2 + $0x4] sm:$0xf]  ;;  %v51_v13 = vld [vmem:[#allocation2 + $0x8] sm:$0xf] }
   0x9   :  { %33 = vst [vmem:[#allocation6] sm:$0xf] %v187_v0  ;;  %v47_v8 = vmul.f32 %v42_v7, %v42_v7  ;;  %v56_v14 = vmul.f32 %v51_v13, %v51_v13  ;;  %v59_v19 = vld [vmem:[#allocation2 + $0xc] sm:$0xf]  ;;  %s72_s16 = sshll.u32 %s188_s0, 4  ;;  %s74_s19 = sshll.u32 %s215_s1, 4  ;;  %s73_s16 = int_to_ptr.vmem [resolvable:$true] %s72_s16  ;;  %s75_s19 = int_to_ptr.hbm [resolvable:$true] %s74_s19 }
   0xa   :  { %v64_v20 = vmul.f32 %v59_v19, %v59_v19  ;;  %s189_s20 = smov [#allocation6]   ;;  %s85_s24 = sshll.u32 %s216_s2, 4  ;;  %s86_s24 = int_to_ptr.hbm [resolvable:$true] %s85_s24 }
   0xb   :  { %s83_s21 = sshll.u32 %s189_s20, 4  ;;  %s84_s21 = int_to_ptr.vmem [resolvable:$true] %s83_s21 }
   0xf   :  { %v35_v2 = vld [vmem:[#allocation5] sm:$0xf] }
  0x10   :  { %v36_v4 = vadd.f32 %v35_v2, %v34_v1  ;;  %v38_v5 = vld [vmem:[#allocation6] sm:$0xf] }
  0x11   :  { %v40_v6 = vadd.f32 %v39_v3, %v38_v5 }
  0x12   :  { %37 = vst [vmem:[#allocation5] sm:$0xf] %v36_v4 }
  0x13   :  { %41 = vst [vmem:[#allocation6] sm:$0xf] %v40_v6 }
  0x19   :  { %v43_v9 = vld [vmem:[#allocation5] sm:$0xf] }
  0x1a   :  { %v44_v10 = vadd.f32 %v43_v9, %v42_v7  ;;  %v46_v11 = vld [vmem:[#allocation6] sm:$0xf] }
  0x1b   :  { %v48_v12 = vadd.f32 %v47_v8, %v46_v11 }
  0x1c   :  { %45 = vst [vmem:[#allocation5] sm:$0xf] %v44_v10 }
  0x1d   :  { %49 = vst [vmem:[#allocation6] sm:$0xf] %v48_v12 }
  0x23   :  { %v52_v15 = vld [vmem:[#allocation5] sm:$0xf] }
  0x24   :  { %v53_v16 = vadd.f32 %v52_v15, %v51_v13  ;;  %v55_v17 = vld [vmem:[#allocation6] sm:$0xf] }
  0x25   :  { %v57_v18 = vadd.f32 %v56_v14, %v55_v17 }
  0x26   :  { %54 = vst [vmem:[#allocation5] sm:$0xf] %v53_v16 }
  0x27   :  { %58 = vst [vmem:[#allocation6] sm:$0xf] %v57_v18 }
  0x2d   :  { %v60_v21 = vld [vmem:[#allocation5] sm:$0xf] }
  0x2e   :  { %v61_v22 = vadd.f32 %v60_v21, %v59_v19  ;;  %v63_v23 = vld [vmem:[#allocation6] sm:$0xf] }
  0x2f   :  { %v65_v24 = vadd.f32 %v64_v20, %v63_v23 }
  0x30   :  { %62 = vst [vmem:[#allocation5] sm:$0xf] %v61_v22 }
  0x31   :  { %66 = vst [vmem:[#allocation6] sm:$0xf] %v65_v24  ;;  %77 = dma.vmem_to_hbm [thread:$0]  %s73_s16, 64, %s75_s19, [#allocation4]  }
  0x32   :  { %88 = dma.vmem_to_hbm [thread:$0]  %s84_s21, 64, %s86_s24, [#allocation7]  }
  0x33   :  { %180 = dma.done.wait [#allocation4], 64  }
  0x34   :  { %181 = vsyncadd [#allocation4], 4294967232 }
  0x35   :  { %182 = dma.done.wait [#allocation7], 64  }
  0x36   :  { %183 = vsyncadd [#allocation7], 4294967232 }
  0x37   :  { %97 = vsyncpa [#allocation3], 1 }
  0x38   :  { %98 = vsyncpa [#allocation4], 1 }
  0x39   :  { %99 = vsyncpa [#allocation7], 1 }

</bundles_post_ra>
